<compile_context>
chip_gen: v7x
topology: tpu7x:2x2x1
jax: 0.10.0
libtpu: 0.0.40
codegen_flags: <defaults>
</compile_context>

<pallas_src>
import functools

import jax
import jax.numpy as jnp
from jax.experimental import pallas as pl
from jax.experimental.pallas import tpu as pltpu

LANE = 128  # TPU lane width; hidden / output feature dims are padded to this.


def _qvalue_kernel(x_ref, a_ref, w1x_ref, w1a_ref, b1_ref, w2_ref, b2_ref,
                   w3_ref, b3_ref, out_ref):
    # Fused concat: h1 = relu(x @ W1[:S] + a @ W1[S:] + b1)
    h1 = jnp.dot(x_ref[...], w1x_ref[...], preferred_element_type=jnp.float32)
    h1 = h1 + jnp.dot(a_ref[...], w1a_ref[...],
                      preferred_element_type=jnp.float32)
    h1 = jnp.maximum(h1 + b1_ref[...], 0.0)                       # [TB, 128]

    h2 = jnp.dot(h1, w2_ref[...], preferred_element_type=jnp.float32)
    h2 = jnp.maximum(h2 + b2_ref[...], 0.0)                       # [TB, 128]

    # Lane-dense final layer: w3 zero-padded to [128, 128]; column 0 holds q.
    q = jnp.dot(h2, w3_ref[...], preferred_element_type=jnp.float32)
    out_ref[...] = (q + b3_ref[...]).astype(out_ref.dtype)        # [TB, 128]


def prepare_params(params, state_dim, action_dim, hidden_dim):
    """Split fc1 at the (state, action) boundary and zero-pad all feature dims
    to the 128-lane width.  Zero padding is exact: padded hidden units see zero
    weight and zero bias, so relu(0) = 0 and they contribute nothing."""
    w1, b1, w2, b2, w3, b3 = params
    pad_h = LANE - hidden_dim

    w1x = jnp.pad(w1[:state_dim], ((0, 0), (0, pad_h)))           # [S, 128]
    w1a = jnp.pad(w1[state_dim:], ((0, 0), (0, pad_h)))           # [A, 128]
    b1p = jnp.pad(b1, ((0, 0), (0, pad_h)))                       # [1, 128]
    w2p = jnp.pad(w2, ((0, pad_h), (0, pad_h)))                   # [128, 128]
    b2p = jnp.pad(b2, ((0, 0), (0, pad_h)))                       # [1, 128]
    w3p = jnp.pad(w3, ((0, pad_h), (0, LANE - 1)))                # [128, 128]
    b3p = jnp.pad(b3, ((0, 0), (0, LANE - 1)))                    # [1, 128]
    return (w1x, w1a, b1p, w2p, b2p, w3p, b3p)


@jax.jit
def qvalue_forward(x, a, padded_params):
    """x: [B, state_dim], a: [B, action_dim] -> q: [B, 1] (float32)."""
    w1x, w1a, b1, w2, b2, w3, b3 = padded_params
    batch, state_dim = x.shape
    action_dim = a.shape[1]

    # Batch tiling: <=256-row tiles keep VMEM use bounded regardless of the
    # replay-buffer batch size (fits v7x's 64 MiB with large margin) and give
    # double-buffered input DMA under the matmuls.  Pad the tail block.
    tb = min(256, ((batch + 7) // 8) * 8)
    n_blocks = pl.cdiv(batch, tb)
    b_pad = n_blocks * tb
    if b_pad != batch:
        x = jnp.pad(x, ((0, b_pad - batch), (0, 0)))
        a = jnp.pad(a, ((0, b_pad - batch), (0, 0)))

    # Weights/biases: full-array blocks with a constant index_map -> fetched
    # once, VMEM-resident across all grid steps.
    resident = lambda arr: pl.BlockSpec(arr.shape, lambda i: (0, 0))

    out = pl.pallas_call(
        _qvalue_kernel,
        out_shape=jax.ShapeDtypeStruct((b_pad, LANE), jnp.float32),
        grid=(n_blocks,),
        in_specs=[
            pl.BlockSpec((tb, state_dim), lambda i: (i, 0)),      # x tile
            pl.BlockSpec((tb, action_dim), lambda i: (i, 0)),     # a tile
            resident(w1x), resident(w1a), resident(b1),
            resident(w2), resident(b2),
            resident(w3), resident(b3),
        ],
        out_specs=pl.BlockSpec((tb, LANE), lambda i: (i, 0)),
        compiler_params=pltpu.CompilerParams(
            dimension_semantics=("parallel",)),  # 2-TC sharding on v7x
    )(x, a, w1x, w1a, b1, w2, b2, w3, b3)

    # Real q is column 0 of the lane-dense output block.
    return out[:batch, 0:1]


def init_params(key, state_dim, hidden_dim, action_dim):
    """Deterministic init mimicking torch.nn.Linear (uniform +/- 1/sqrt(fan_in)).
    Weights stored as [in, out] (transposed vs PyTorch)."""
    def linear(k, fan_in, fan_out):
        kw, kb = jax.random.split(k)
        bound = 1.0 / jnp.sqrt(float(fan_in))
        w = jax.random.uniform(kw, (fan_in, fan_out), jnp.float32,
                               minval=-bound, maxval=bound)
        b = jax.random.uniform(kb, (1, fan_out), jnp.float32,
                               minval=-bound, maxval=bound)
        return w, b

    k1, k2, k3 = jax.random.split(key, 3)
    w1, b1 = linear(k1, state_dim + action_dim, hidden_dim)
    w2, b2 = linear(k2, hidden_dim, hidden_dim)
    w3, b3 = linear(k3, hidden_dim, 1)
    return (w1, b1, w2, b2, w3, b3)


if __name__ == "__main__":
    # Pendulum-v1: observation dim = 3, action dim = 1; hidden_dim = 64.
    state_dim, action_dim, hidden_dim = 3, 1, 64
    batch = 8

    key = jax.random.PRNGKey(0)
    k_params, k_x, k_a = jax.random.split(key, 3)

    params = init_params(k_params, state_dim, hidden_dim, action_dim)
    padded_params = prepare_params(params, state_dim, action_dim, hidden_dim)

    x = jax.random.normal(k_x, (batch, state_dim), jnp.float32)
    a = jax.random.normal(k_a, (batch, action_dim), jnp.float32)

    q = qvalue_forward(x, a, padded_params)
    jax.block_until_ready(q)

    # Pure-JAX reference (unpadded params, explicit concat as in PyTorch).
    w1, b1, w2, b2, w3, b3 = params
    xa = jnp.concatenate([x, a], axis=1)
    h1 = jnp.maximum(xa @ w1 + b1, 0.0)
    h2 = jnp.maximum(h1 @ w2 + b2, 0.0)
    q_ref = h2 @ w3 + b3

    assert q.shape == (batch, 1)
    assert jnp.allclose(q, q_ref, atol=1e-5, rtol=1e-5)

    print("KERNEL_OK")
</pallas_src>

<mosaic_0001>
module attributes {stable_mosaic.version = 11 : i64} {
  func.func @_qvalue_kernel(%arg0: i32, %arg1: memref<8x3xf32, #tpu.memory_space<vmem>>, %arg2: memref<8x1xf32, #tpu.memory_space<vmem>>, %arg3: memref<3x128xf32, #tpu.memory_space<vmem>>, %arg4: memref<1x128xf32, #tpu.memory_space<vmem>>, %arg5: memref<1x128xf32, #tpu.memory_space<vmem>>, %arg6: memref<128x128xf32, #tpu.memory_space<vmem>>, %arg7: memref<1x128xf32, #tpu.memory_space<vmem>>, %arg8: memref<128x128xf32, #tpu.memory_space<vmem>>, %arg9: memref<1x128xf32, #tpu.memory_space<vmem>>, %arg10: memref<8x128xf32, #tpu.memory_space<vmem>>) attributes {dimension_semantics = [#tpu.dimension_semantics<parallel>], iteration_bounds = array<i64: 1>, scalar_prefetch = 0 : i64, scratch_operands = 0 : i64, tpu.core_type = #tpu.core_type<tc>, window_params = [{transform_indices = @transform_0, window_bounds = array<i64: 8, 3>}, {transform_indices = @transform_1, window_bounds = array<i64: 8, 1>}, {pipeline_mode = #tpu.pipeline_mode<synchronous>, transform_indices = @transform_2, window_bounds = array<i64: 3, 128>}, {pipeline_mode = #tpu.pipeline_mode<synchronous>, transform_indices = @transform_3, window_bounds = array<i64: 1, 128>}, {pipeline_mode = #tpu.pipeline_mode<synchronous>, transform_indices = @transform_4, window_bounds = array<i64: 1, 128>}, {pipeline_mode = #tpu.pipeline_mode<synchronous>, transform_indices = @transform_5, window_bounds = array<i64: 128, 128>}, {pipeline_mode = #tpu.pipeline_mode<synchronous>, transform_indices = @transform_6, window_bounds = array<i64: 1, 128>}, {pipeline_mode = #tpu.pipeline_mode<synchronous>, transform_indices = @transform_7, window_bounds = array<i64: 128, 128>}, {pipeline_mode = #tpu.pipeline_mode<synchronous>, transform_indices = @transform_8, window_bounds = array<i64: 1, 128>}, {transform_indices = @transform_9, window_bounds = array<i64: 8, 128>}]} {
    %c0 = arith.constant 0 : index
    %c0_0 = arith.constant 0 : index
    %0 = vector.load %arg1[%c0, %c0_0] : memref<8x3xf32, #tpu.memory_space<vmem>>, vector<8x3xf32>
    %c0_1 = arith.constant 0 : index
    %c0_2 = arith.constant 0 : index
    %1 = vector.load %arg3[%c0_1, %c0_2] : memref<3x128xf32, #tpu.memory_space<vmem>>, vector<3x128xf32>
    %cst = arith.constant dense<0.000000e+00> : vector<8x128xf32>
    %2 = tpu.matmul %0, %1, %cst {dimension_numbers = #tpu.dot_dimension_numbers<[1], [0], [0], [1], [0, 0, 1, 1], [], []>} : vector<8x3xf32>, vector<3x128xf32>, vector<8x128xf32> -> vector<8x128xf32>
    %c0_3 = arith.constant 0 : index
    %c0_4 = arith.constant 0 : index
    %3 = vector.load %arg2[%c0_3, %c0_4] : memref<8x1xf32, #tpu.memory_space<vmem>>, vector<8x1xf32>
    %c0_5 = arith.constant 0 : index
    %c0_6 = arith.constant 0 : index
    %4 = vector.load %arg4[%c0_5, %c0_6] : memref<1x128xf32, #tpu.memory_space<vmem>>, vector<1x128xf32>
    %cst_7 = arith.constant dense<0.000000e+00> : vector<8x128xf32>
    %5 = tpu.matmul %3, %4, %cst_7 {dimension_numbers = #tpu.dot_dimension_numbers<[1], [0], [0], [1], [0, 0, 1, 1], [], []>} : vector<8x1xf32>, vector<1x128xf32>, vector<8x128xf32> -> vector<8x128xf32>
    %6 = arith.addf %2, %5 : vector<8x128xf32>
    %c0_8 = arith.constant 0 : index
    %c0_9 = arith.constant 0 : index
    %7 = vector.load %arg5[%c0_8, %c0_9] : memref<1x128xf32, #tpu.memory_space<vmem>>, vector<1x128xf32>
    %8 = vector.broadcast %7 : vector<1x128xf32> to vector<8x128xf32>
    %9 = arith.addf %6, %8 : vector<8x128xf32>
    %cst_10 = arith.constant 0.000000e+00 : f32
    %10 = vector.broadcast %cst_10 : f32 to vector<8x128xf32>
    %11 = arith.maximumf %9, %10 : vector<8x128xf32>
    %c0_11 = arith.constant 0 : index
    %c0_12 = arith.constant 0 : index
    %12 = vector.load %arg6[%c0_11, %c0_12] : memref<128x128xf32, #tpu.memory_space<vmem>>, vector<128x128xf32>
    %cst_13 = arith.constant dense<0.000000e+00> : vector<8x128xf32>
    %13 = tpu.matmul %11, %12, %cst_13 {dimension_numbers = #tpu.dot_dimension_numbers<[1], [0], [0], [1], [0, 0, 1, 1], [], []>} : vector<8x128xf32>, vector<128x128xf32>, vector<8x128xf32> -> vector<8x128xf32>
    %c0_14 = arith.constant 0 : index
    %c0_15 = arith.constant 0 : index
    %14 = vector.load %arg7[%c0_14, %c0_15] : memref<1x128xf32, #tpu.memory_space<vmem>>, vector<1x128xf32>
    %15 = vector.broadcast %14 : vector<1x128xf32> to vector<8x128xf32>
    %16 = arith.addf %13, %15 : vector<8x128xf32>
    %cst_16 = arith.constant 0.000000e+00 : f32
    %17 = vector.broadcast %cst_16 : f32 to vector<8x128xf32>
    %18 = arith.maximumf %16, %17 : vector<8x128xf32>
    %c0_17 = arith.constant 0 : index
    %c0_18 = arith.constant 0 : index
    %19 = vector.load %arg8[%c0_17, %c0_18] : memref<128x128xf32, #tpu.memory_space<vmem>>, vector<128x128xf32>
    %cst_19 = arith.constant dense<0.000000e+00> : vector<8x128xf32>
    %20 = tpu.matmul %18, %19, %cst_19 {dimension_numbers = #tpu.dot_dimension_numbers<[1], [0], [0], [1], [0, 0, 1, 1], [], []>} : vector<8x128xf32>, vector<128x128xf32>, vector<8x128xf32> -> vector<8x128xf32>
    %c0_20 = arith.constant 0 : index
    %c0_21 = arith.constant 0 : index
    %21 = vector.load %arg9[%c0_20, %c0_21] : memref<1x128xf32, #tpu.memory_space<vmem>>, vector<1x128xf32>
    %22 = vector.broadcast %21 : vector<1x128xf32> to vector<8x128xf32>
    %23 = arith.addf %20, %22 : vector<8x128xf32>
    %c0_22 = arith.constant 0 : index
    %c0_23 = arith.constant 0 : index
    %24 = vector.load %arg10[%c0_22, %c0_23] : memref<8x128xf32, #tpu.memory_space<vmem>>, vector<8x128xf32>
    tpu.vector_store %arg10[%c0_22, %c0_23], %23 {strides = array<i32>} : memref<8x128xf32, #tpu.memory_space<vmem>>, vector<8x128xf32>,
    return
  }
  func.func @transform_0(%arg0: i32) -> (i32, i32) {
    %c0_i32 = arith.constant 0 : i32
    %c0_i32_0 = arith.constant 0 : i32
    return %arg0, %c0_i32 : i32, i32
  }
  func.func @transform_1(%arg0: i32) -> (i32, i32) {
    %c0_i32 = arith.constant 0 : i32
    %c0_i32_0 = arith.constant 0 : i32
    return %arg0, %c0_i32 : i32, i32
  }
  func.func @transform_2(%arg0: i32) -> (i32, i32) {
    %c0_i32 = arith.constant 0 : i32
    %c0_i32_0 = arith.constant 0 : i32
    %c0_i32_1 = arith.constant 0 : i32
    return %c0_i32, %c0_i32_0 : i32, i32
  }
  func.func @transform_3(%arg0: i32) -> (i32, i32) {
    %c0_i32 = arith.constant 0 : i32
    %c0_i32_0 = arith.constant 0 : i32
    %c0_i32_1 = arith.constant 0 : i32
    return %c0_i32, %c0_i32_0 : i32, i32
  }
  func.func @transform_4(%arg0: i32) -> (i32, i32) {
    %c0_i32 = arith.constant 0 : i32
    %c0_i32_0 = arith.constant 0 : i32
    %c0_i32_1 = arith.constant 0 : i32
    return %c0_i32, %c0_i32_0 : i32, i32
  }
  func.func @transform_5(%arg0: i32) -> (i32, i32) {
    %c0_i32 = arith.constant 0 : i32
    %c0_i32_0 = arith.constant 0 : i32
    %c0_i32_1 = arith.constant 0 : i32
    return %c0_i32, %c0_i32_0 : i32, i32
  }
  func.func @transform_6(%arg0: i32) -> (i32, i32) {
    %c0_i32 = arith.constant 0 : i32
    %c0_i32_0 = arith.constant 0 : i32
    %c0_i32_1 = arith.constant 0 : i32
    return %c0_i32, %c0_i32_0 : i32, i32
  }
  func.func @transform_7(%arg0: i32) -> (i32, i32) {
    %c0_i32 = arith.constant 0 : i32
    %c0_i32_0 = arith.constant 0 : i32
    %c0_i32_1 = arith.constant 0 : i32
    return %c0_i32, %c0_i32_0 : i32, i32
  }
  func.func @transform_8(%arg0: i32) -> (i32, i32) {
    %c0_i32 = arith.constant 0 : i32
    %c0_i32_0 = arith.constant 0 : i32
    %c0_i32_1 = arith.constant 0 : i32
    return %c0_i32, %c0_i32_0 : i32, i32
  }
  func.func @transform_9(%arg0: i32) -> (i32, i32) {
    %c0_i32 = arith.constant 0 : i32
    %c0_i32_0 = arith.constant 0 : i32
    return %arg0, %c0_i32 : i32, i32
  }
}

</mosaic_0001>

<bundles_post_ra>
// kernel: qvalue_forward.1
= control target key start
LH: loop header
LB: loop body
LE: loop exit
PB: predicated region body
PF: predicated region fallthrough
CT: control target
= control target key end

     0   :  { %14 = vsyncpa [#allocation3], 0  ;;  %s776_s0 = inlined_call_operand.vmem [shape: f32[8,3], index: 0, kind: input, shape index: {}]   ;;  %s777_s1 = inlined_call_operand.vmem [shape: f32[8,1], index: 1, kind: input, shape index: {}]   ;;  %s778_s2 = inlined_call_operand.vmem [shape: f32[3,128], index: 2, kind: input, shape index: {}]   ;;  %s779_s3 = inlined_call_operand.vmem [shape: f32[1,128], index: 3, kind: input, shape index: {}]   ;;  %s780_s4 = inlined_call_operand.vmem [shape: f32[1,128], index: 4, kind: input, shape index: {}]   ;;  %s781_s5 = inlined_call_operand.hbm [shape: f32[128,128], index: 5, kind: input, shape index: {}]   ;;  %s782_s6 = inlined_call_operand.vmem [shape: f32[1,128], index: 6, kind: input, shape index: {}]   ;;  %s783_s7 = inlined_call_operand.hbm [shape: f32[128,128], index: 7, kind: input, shape index: {}]   ;;  %s784_s8 = inlined_call_operand.vmem [shape: f32[1,128], index: 8, kind: input, shape index: {}]   ;;  %s785_s9 = inlined_call_operand.vmem [shape: f32[8,128], index: 9, kind: output, shape index: {}]  }
   0x1   :  { %15 = vsyncpa [#allocation5], 0  ;;  %s651_s30 = smov [#allocation2]   ;;  %s603_s13 = scalar_lea.hbm %s781_s5, 2048 }
   0x2   :  { %s31_s10 = sshll.u32 %s651_s30, 4  ;;  %p604_p0 = scmp.ne.s32.totalorder %s781_s5, %s603_s13  ;;  %s32_s10 = int_to_ptr.vmem [resolvable:$true] %s31_s10 }
   0x3   :  { %p607_p1 = scmp.lt.u32.totalorder %s603_s13, %s781_s5 }
   0x5   :  { %p609_p2 = pnand %p607_p1, %p604_p0 }
   0x7   :  { %612 = shalt.err (!%p609_p2)
}
   0x8   :  { %s613_s18 = scalar_lea.vmem %s32_s10, 2048  ;;  %p618_p4 = scmp.lt.s32.totalorder %s32_s10, %s32_s10 }
   0x9   :  { %p614_p3 = scmp.ne.s32.totalorder %s32_s10, %s613_s18  ;;  %p619_p5 = scmp.lt.s32.totalorder %s613_s18, %s613_s18 }
   0xb   :  { %p620_p6 = por %p619_p5, %p618_p4 }
   0xd   :  { %p621_p7 = pnand %p620_p6, %p614_p3 }
   0xf   :  { %624 = shalt.err (!%p621_p7)
}
  0x10   :  { %s652_s19 = smov 128   ;;  %s653_s20 = smov 8  }
  0x11   :  { %37 = dma.hbm_to_vmem [thread:$0]  %s781_s5, 2048, %s32_s10, [#allocation3], %s652_s19, %s652_s19, %s653_s20  }
  0x12   :  { %s654_s23 = smov [#allocation4]   ;;  %s625_s27 = scalar_lea.hbm %s783_s7, 2048 }
  0x13   :  { %s45_s24 = sshll.u32 %s654_s23, 4  ;;  %p626_p8 = scmp.ne.s32.totalorder %s783_s7, %s625_s27  ;;  %s46_s24 = int_to_ptr.vmem [resolvable:$true] %s45_s24 }
  0x14   :  { %p629_p9 = scmp.lt.u32.totalorder %s625_s27, %s783_s7 }
  0x16   :  { %p631_p10 = pnand %p629_p9, %p626_p8 }
  0x18   :  { %634 = shalt.err (!%p631_p10)
}
  0x19   :  { %s635_s12 = scalar_lea.vmem %s46_s24, 2048  ;;  %p640_p12 = scmp.lt.s32.totalorder %s46_s24, %s46_s24 }
  0x1a   :  { %p636_p11 = scmp.ne.s32.totalorder %s46_s24, %s635_s12  ;;  %p641_p13 = scmp.lt.s32.totalorder %s635_s12, %s635_s12 }
  0x1c   :  { %p642_p0 = por %p641_p13, %p640_p12 }
  0x1e   :  { %p643_p1 = pnand %p642_p0, %p636_p11 }
  0x20   :  { %646 = shalt.err (!%p643_p1)
}
  0x21   :  { %51 = dma.hbm_to_vmem [thread:$0]  %s783_s7, 2048, %s46_s24, [#allocation5], %s652_s19, %s652_s19, %s653_s20  }
  0x22   :  { %647 = dma.done.wait [#allocation3], 2048  }
  0x23   :  { %648 = vsyncadd [#allocation3], 4294965248 }
  0x24   :  { %649 = dma.done.wait [#allocation5], 2048  }
  0x25   :  { %650 = vsyncadd [#allocation5], 4294965248  ;;  %v655_v0 = vmov 0.0   ;;  %vm656_vm0 = vmmov 0   ;;  %vm68_vm1 = vcmask 1040384   ;;  %vm146_vm2 = vcmask 1042432  }
  0x26   :  { %468 = vmatprep.subr.mxu0 %v655_v0  ;;  %473 = vmatprep.subr.mxu1 %v655_v0  ;;  %vm64_vm3 = vcmask 7168   ;;  %vm142_vm4 = vcmask 23552   ;;  %v63_v1 = vld [vmem:[%s779_s3] sm:$0x1]  ;;  %v230_v6 = vld [vmem:[#allocation2 + $0x8] sm:$0xff]  ;;  %v231_v8 = vld [vmem:[#allocation2 + $0x10] sm:$0xff] }
  0x27   :  { %470 = vmatprep.mubr.msk.f32.mxu0 %vm656_vm0, %v655_v0  ;;  %475 = vmatprep.mubr.msk.f32.mxu1 %vm656_vm0, %v655_v0  ;;  %v61_v2 = vld [vmem:[%s778_s2] sm:$0x7]  ;;  %v232_v9 = vld [vmem:[#allocation2 + $0x18] sm:$0xff]  ;;  %v657_v10 = vmov 0.0|0.0   ;;  %v234_v13 = vld [vmem:[#allocation2 + $0x28] sm:$0xff] }
  0x28   :  { %v62_v3 = vld [vmem:[%s777_s1] sm:$0xff]  ;;  %469 = vmatpush3.msk.msra.mxu0 %vm68_vm1, %v63_v1  ;;  %474 = vmatpush3.msk.msra.mxu1 %vm146_vm2, %v61_v2  ;;  %v552_v11 = vpack.c.bf16 %v232_v9, %v231_v8  ;;  %v235_v15 = vld [vmem:[#allocation2 + $0x30] sm:$0xff]  ;;  %v236_v16 = vld [vmem:[#allocation2 + $0x38] sm:$0xff] }
  0x29   :  { %v60_v4 = vld [vmem:[%s776_s0] sm:$0xff]  ;;  %471 = vmatmul.mubr.msk.f32.vlgmr.msra.gmra.mrb[0].mxu0 %vm64_vm3, %v62_v3  ;;  %548 = vmatprep.subr.bf16.mxu0 %v657_v10  ;;  %v558_v17 = vpack.c.bf16 %v236_v16, %v235_v15  ;;  %v238_v19 = vld [vmem:[#allocation2 + $0x48] sm:$0xff]  ;;  %v239_v21 = vld [vmem:[#allocation2 + $0x50] sm:$0xff] }
  0x2a   :  { %v229_v5 = vld [vmem:[#allocation2] sm:$0xff]  ;;  %476 = vmatmul.mubr.msk.f32.vlgmr.msra.gmra.mrb[0].mxu1 %vm142_vm4, %v60_v4  ;;  %510 = vmatprep.mubr.msk.f32.mxu0 %vm656_vm0, %v655_v0  ;;  %v240_v22 = vld [vmem:[#allocation2 + $0x58] sm:$0xff]  ;;  %v242_v25 = vld [vmem:[#allocation2 + $0x68] sm:$0xff] }
  0x2b   :  { %v549_v7 = vpack.c.bf16 %v230_v6, %v229_v5  ;;  %572 = vmatprep.subr.bf16.mxu1 %v657_v10  ;;  %v233_v12 = vld [vmem:[#allocation2 + $0x20] sm:$0xff]  ;;  %545 = vmatprep.mubr.msk.f32.mxu1 %vm656_vm0, %v655_v0  ;;  %v564_v23 = vpack.c.bf16 %v240_v22, %v239_v21  ;;  %v243_v27 = vld [vmem:[#allocation2 + $0x70] sm:$0xff]  ;;  %v244_v28 = vld [vmem:[#allocation2 + $0x78] sm:$0xff] }
  0x2c   :  { %v555_v14 = vpack.c.bf16 %v234_v13, %v233_v12  ;;  %v237_v18 = vld [vmem:[#allocation2 + $0x40] sm:$0xff]  ;;  %v570_v29 = vpack.c.bf16 %v244_v28, %v243_v27  ;;  %v324_v31 = vld [vmem:[#allocation4 + $0x8] sm:$0xff]  ;;  %v325_v32 = vld [vmem:[#allocation4 + $0x10] sm:$0xff] }
  0x2d   :  { %550 = vmatpush3.bf16.msra.mxu0 %v549_v7  ;;  %v561_v20 = vpack.c.bf16 %v238_v19, %v237_v18  ;;  %v241_v24 = vld [vmem:[#allocation2 + $0x60] sm:$0xff]  ;;  %v326_v34 = vld [vmem:[#allocation4 + $0x18] sm:$0xff]  ;;  %v328_v37 = vld [vmem:[#allocation4 + $0x28] sm:$0xff] }
  0x2e   :  { %551 = vmatprep.subr.bf16.mxu0 %v657_v10  ;;  %v567_v26 = vpack.c.bf16 %v242_v25, %v241_v24  ;;  %v323_v30 = vld [vmem:[#allocation4] sm:$0xff]  ;;  %v576_v35 = vpack.c.bf16 %v326_v34, %v325_v32  ;;  %v329_v39 = vld [vmem:[#allocation4 + $0x30] sm:$0xff]  ;;  %v330_v40 = vld [vmem:[#allocation4 + $0x38] sm:$0xff] }
  0x2f   :  { %v573_v33 = vpack.c.bf16 %v324_v31, %v323_v30  ;;  %v327_v36 = vld [vmem:[#allocation4 + $0x20] sm:$0xff]  ;;  %v582_v41 = vpack.c.bf16 %v330_v40, %v329_v39  ;;  %v332_v43 = vld [vmem:[#allocation4 + $0x48] sm:$0xff]  ;;  %v333_v45 = vld [vmem:[#allocation4 + $0x50] sm:$0xff] }
  0x30   :  { %v579_v38 = vpack.c.bf16 %v328_v37, %v327_v36  ;;  %v331_v42 = vld [vmem:[#allocation4 + $0x40] sm:$0xff]  ;;  %v334_v46 = vld [vmem:[#allocation4 + $0x58] sm:$0xff]  ;;  %v336_v49 = vld [vmem:[#allocation4 + $0x68] sm:$0xff] }
  0x31   :  { %553 = vmatpush3.bf16.msra.mxu0 %v552_v11  ;;  %574 = vmatpush3.bf16.msra.mxu1 %v573_v33  ;;  %v585_v44 = vpack.c.bf16 %v332_v43, %v331_v42  ;;  %v588_v47 = vpack.c.bf16 %v334_v46, %v333_v45  ;;  %v335_v48 = vld [vmem:[#allocation4 + $0x60] sm:$0xff]  ;;  %v337_v59 = vld [vmem:[#allocation4 + $0x70] sm:$0xff]  ;;  %v338_v60 = vld [vmem:[#allocation4 + $0x78] sm:$0xff] }
  0x32   :  { %554 = vmatprep.subr.bf16.mxu0 %v657_v10  ;;  %575 = vmatprep.subr.bf16.mxu1 %v657_v10  ;;  %v591_v50 = vpack.c.bf16 %v336_v49, %v335_v48  ;;  %v427_v53 = vld [vmem:[%s780_s4] ss:$0 sm:$0xff]  ;;  %v594_v61 = vpack.c.bf16 %v338_v60, %v337_v59 }
  0x33   :  { %v428_v62 = vld [vmem:[%s782_s6] ss:$0 sm:$0xff] }
  0x34   :  { %v429_v3 = vld [vmem:[%s784_s8] ss:$0 sm:$0xff] }
  0x35   :  { %556 = vmatpush3.bf16.msra.mxu0 %v555_v14  ;;  %577 = vmatpush3.bf16.msra.mxu1 %v576_v35 }
  0x36   :  { %557 = vmatprep.subr.bf16.mxu0 %v657_v10  ;;  %578 = vmatprep.subr.bf16.mxu1 %v657_v10 }
  0x39   :  { %559 = vmatpush3.bf16.msra.mxu0 %v558_v17  ;;  %580 = vmatpush3.bf16.msra.mxu1 %v579_v38 }
  0x3a   :  { %560 = vmatprep.subr.bf16.mxu0 %v657_v10  ;;  %581 = vmatprep.subr.bf16.mxu1 %v657_v10 }
  0x3d   :  { %562 = vmatpush3.bf16.msra.mxu0 %v561_v20  ;;  %583 = vmatpush3.bf16.msra.mxu1 %v582_v41 }
  0x3e   :  { %563 = vmatprep.subr.bf16.mxu0 %v657_v10  ;;  %584 = vmatprep.subr.bf16.mxu1 %v657_v10 }
  0x41   :  { %565 = vmatpush3.bf16.msra.mxu0 %v564_v23  ;;  %586 = vmatpush3.bf16.msra.mxu1 %v585_v44 }
  0x42   :  { %566 = vmatprep.subr.bf16.mxu0 %v657_v10  ;;  %587 = vmatprep.subr.bf16.mxu1 %v657_v10 }
  0x45   :  { %568 = vmatpush3.bf16.msra.mxu0 %v567_v26  ;;  %589 = vmatpush3.bf16.msra.mxu1 %v588_v47 }
  0x46   :  { %569 = vmatprep.subr.bf16.mxu0 %v657_v10  ;;  %590 = vmatprep.subr.bf16.mxu1 %v657_v10 }
  0x49   :  { %571 = vmatpush3.bf16.msra.mxu0 %v570_v29  ;;  %592 = vmatpush3.bf16.msra.mxu1 %v591_v50 }
  0x4a   :  { %593 = vmatprep.subr.bf16.mxu1 %v657_v10 }
  0x4d   :  { %595 = vmatpush3.bf16.msra.mxu1 %v594_v61 }
  0xfc   :  { %v138_v51 = vpop.f32.mrb[0].mxu0 }
  0xfd   :  { %v216_v52 = vpop.f32.mrb[0].mxu1  ;;  %v472_v55 = vpop.f32.mrb[1].mxu0 }
  0xfe   :  { %v217_v54 = vadd.f32 %v216_v52, %v138_v51  ;;  %v477_v56 = vpop.f32.mrb[1].mxu1 }
 0x100   :  { %v227_v57 = vadd.f32 %v427_v53, %v217_v54 }
 0x102   :  { %v228_v58 = vmax.f32 %v227_v57, 0.0 }
 0x104   :  { %511 = vmatmul.mubr.f32.vlgmr.msra.gmra.mrb[2].mxu0 %v228_v58 }
 0x1d7   :  { %v318_v63 = vpop.f32.mrb[2].mxu0 }
 0x1d8   :  { %v319_v0 = vadd.f32 %v428_v62, %v318_v63  ;;  %v512_v1 = vpop.f32.mrb[3].mxu0 }
 0x1da   :  { %v322_v2 = vmax.f32 %v319_v0, 0.0 }
 0x1dc   :  { %546 = vmatmul.mubr.f32.vlgmr.msra.gmra.mrb[2].mxu1 %v322_v2 }
 0x2af   :  { %v412_v4 = vpop.f32.mrb[2].mxu1 }
 0x2b0   :  { %v413_v5 = vadd.f32 %v429_v3, %v412_v4  ;;  %v547_v6 = vpop.f32.mrb[3].mxu1 }
 0x2b2   :  { %416 = vst [vmem:[%s785_s9] sm:$0xff] %v413_v5 }
 0x2b3   :  { %421 = vsyncpa [#allocation3], 1 }
 0x2b4   :  { %422 = vsyncpa [#allocation5], 1 }

</bundles_post_ra>
